<compile_context>
chip_gen: v7x
topology: tpu7x:2x2x1
jax: 0.10.0
libtpu: 0.0.40
codegen_flags: <defaults>
</compile_context>

<pallas_src>
import functools

import jax
import jax.numpy as jnp
import numpy as np
from jax.experimental import pallas as pl
from jax.experimental.pallas import tpu as pltpu

H1_LOGICAL, H2_LOGICAL = 400, 300          # PyTorch hidden sizes
H1_PAD, H2_PAD = 512, 384                  # 128-aligned padded sizes
LANE = 128


def _round_up(n, m):
    return ((n + m - 1) // m) * m


def actor_kernel(x_ref, w1_ref, b1_ref, w2_ref, b2_ref, w3_ref, b3_ref, o_ref):
    # One batch tile per grid step; weights are VMEM-resident across the grid.
    x = x_ref[...].astype(jnp.bfloat16)                                     # (TB, S)
    h1 = jnp.dot(x, w1_ref[...], preferred_element_type=jnp.float32) + b1_ref[...]
    h1 = jnp.maximum(h1, 0.0)                                               # ReLU (VPU, f32)
    h2 = jnp.dot(h1.astype(jnp.bfloat16), w2_ref[...],
                 preferred_element_type=jnp.float32) + b2_ref[...]
    h2 = jnp.maximum(h2, 0.0)                                               # ReLU (VPU, f32)
    h3 = jnp.dot(h2.astype(jnp.bfloat16), w3_ref[...],
                 preferred_element_type=jnp.float32) + b3_ref[...]
    o_ref[...] = jnp.tanh(h3)                                               # tanh (EUP), lane-dense 128


def actor_forward(x, params, action_dim):
    """x: (B, state_dim) f32.  Returns (B, action_dim) f32."""
    w1, b1, w2, b2, w3, b3 = params
    B, state_dim = x.shape
    out_pad = w3.shape[1]                         # 128-aligned output width
    assert action_dim <= out_pad

    # Batch tile: up to 256 rows (fills MXU M dim); multiple of 8 sublanes.
    TB = min(256, _round_up(B, 8))
    n_tiles = pl.cdiv(B, TB)
    B_pad = n_tiles * TB
    if B_pad != B:
        x = jnp.pad(x, ((0, B_pad - B), (0, 0)))

    flops = 2 * B_pad * (state_dim * H1_PAD + H1_PAD * H2_PAD + H2_PAD * out_pad)
    bytes_accessed = (
        B_pad * state_dim * 4 + B_pad * out_pad * 4          # x in, out
        + (w1.size + w2.size + w3.size) * 2                  # bf16 weights
        + (b1.size + b2.size + b3.size) * 4                  # f32 biases
    )
    cost = pl.CostEstimate(flops=flops,
                           bytes_accessed=bytes_accessed,
                           transcendentals=B_pad * out_pad)

    resident = lambda shape: pl.BlockSpec(shape, lambda i: (0, 0))

    out = pl.pallas_call(
        actor_kernel,
        out_shape=jax.ShapeDtypeStruct((B_pad, out_pad), jnp.float32),
        grid_spec=pltpu.PrefetchScalarGridSpec(
            num_scalar_prefetch=0,
            grid=(n_tiles,),
            in_specs=[
                pl.BlockSpec((TB, state_dim), lambda i: (i, 0)),   # x: walks batch
                resident(w1.shape), resident(b1.shape),            # weights: stay put
                resident(w2.shape), resident(b2.shape),
                resident(w3.shape), resident(b3.shape),
            ],
            out_specs=pl.BlockSpec((TB, out_pad), lambda i: (i, 0)),
        ),
        compiler_params=pltpu.CompilerParams(
            dimension_semantics=("parallel",),       # shards batch across v7x's 2 TCs
        ),
        cost_estimate=cost,
    )(x, w1, b1, w2, b2, w3, b3)

    return out[:B, :action_dim]


def init_actor_params(key, state_dim, action_dim):
    """PyTorch nn.Linear default init (U[-1/sqrt(fan_in), +]), zero-padded to
    128-aligned widths.  Weights are (in, out) bf16; biases (1, out) f32."""
    out_pad = _round_up(max(action_dim, 1), LANE)

    def linear(key, fan_in, fan_out, in_pad, out_pad_):
        kw, kb = jax.random.split(key)
        bound = 1.0 / np.sqrt(fan_in)
        w = jax.random.uniform(kw, (fan_in, fan_out), jnp.float32, -bound, bound)
        b = jax.random.uniform(kb, (fan_out,), jnp.float32, -bound, bound)
        w_pad = jnp.zeros((in_pad, out_pad_), jnp.float32).at[:fan_in, :fan_out].set(w)
        b_pad = jnp.zeros((1, out_pad_), jnp.float32).at[0, :fan_out].set(b)
        return w_pad.astype(jnp.bfloat16), b_pad     # padded entries are exactly 0

    k1, k2, k3 = jax.random.split(key, 3)
    w1, b1 = linear(k1, state_dim, H1_LOGICAL, state_dim, H1_PAD)
    w2, b2 = linear(k2, H1_LOGICAL, H2_LOGICAL, H1_PAD, H2_PAD)
    w3, b3 = linear(k3, H2_LOGICAL, action_dim, H2_PAD, out_pad)
    return (w1, b1, w2, b2, w3, b3)


def actor_reference(x, params, action_dim):
    """Pure-JAX reference using the same bf16 weights / f32 accumulation."""
    w1, b1, w2, b2, w3, b3 = params
    h = jnp.dot(x.astype(jnp.bfloat16), w1, preferred_element_type=jnp.float32) + b1
    h = jnp.maximum(h, 0.0)
    h = jnp.dot(h.astype(jnp.bfloat16), w2, preferred_element_type=jnp.float32) + b2
    h = jnp.maximum(h, 0.0)
    h = jnp.dot(h.astype(jnp.bfloat16), w3, preferred_element_type=jnp.float32) + b3
    return jnp.tanh(h)[:, :action_dim]


if __name__ == "__main__":
    key = jax.random.PRNGKey(0)
    k_x, k_p = jax.random.split(key)

    batch, state_dim, action_dim = 2, 16, 4
    x = jax.random.normal(k_x, (batch, state_dim), jnp.float32)
    params = init_actor_params(k_p, state_dim, action_dim)

    out = jax.block_until_ready(actor_forward(x, params, action_dim))
    ref = jax.block_until_ready(actor_reference(x, params, action_dim))

    assert out.shape == (batch, action_dim)
    np.testing.assert_allclose(np.asarray(out), np.asarray(ref), rtol=1e-3, atol=1e-3)
    print("KERNEL_OK")
</pallas_src>

<mosaic_0001>
module attributes {stable_mosaic.version = 11 : i64} {
  func.func @actor_kernel(%arg0: i32, %arg1: memref<8x16xf32, #tpu.memory_space<vmem>>, %arg2: memref<16x512xbf16, #tpu.memory_space<vmem>>, %arg3: memref<1x512xf32, #tpu.memory_space<vmem>>, %arg4: memref<512x384xbf16, #tpu.memory_space<vmem>>, %arg5: memref<1x384xf32, #tpu.memory_space<vmem>>, %arg6: memref<384x128xbf16, #tpu.memory_space<vmem>>, %arg7: memref<1x128xf32, #tpu.memory_space<vmem>>, %arg8: memref<8x128xf32, #tpu.memory_space<vmem>>) attributes {dimension_semantics = [#tpu.dimension_semantics<parallel>], iteration_bounds = array<i64: 1>, scalar_prefetch = 0 : i64, scratch_operands = 0 : i64, tpu.core_type = #tpu.core_type<tc>, window_params = [{transform_indices = @transform_0, window_bounds = array<i64: 8, 16>}, {pipeline_mode = #tpu.pipeline_mode<synchronous>, transform_indices = @transform_1, window_bounds = array<i64: 16, 512>}, {pipeline_mode = #tpu.pipeline_mode<synchronous>, transform_indices = @transform_2, window_bounds = array<i64: 1, 512>}, {pipeline_mode = #tpu.pipeline_mode<synchronous>, transform_indices = @transform_3, window_bounds = array<i64: 512, 384>}, {pipeline_mode = #tpu.pipeline_mode<synchronous>, transform_indices = @transform_4, window_bounds = array<i64: 1, 384>}, {pipeline_mode = #tpu.pipeline_mode<synchronous>, transform_indices = @transform_5, window_bounds = array<i64: 384, 128>}, {pipeline_mode = #tpu.pipeline_mode<synchronous>, transform_indices = @transform_6, window_bounds = array<i64: 1, 128>}, {transform_indices = @transform_7, window_bounds = array<i64: 8, 128>}]} {
    %c0 = arith.constant 0 : index
    %c0_0 = arith.constant 0 : index
    %0 = vector.load %arg1[%c0, %c0_0] : memref<8x16xf32, #tpu.memory_space<vmem>>, vector<8x16xf32>
    %1 = arith.truncf %0 : vector<8x16xf32> to vector<8x16xbf16>
    %c0_1 = arith.constant 0 : index
    %c0_2 = arith.constant 0 : index
    %2 = vector.load %arg2[%c0_1, %c0_2] : memref<16x512xbf16, #tpu.memory_space<vmem>>, vector<16x512xbf16>
    %cst = arith.constant dense<0.000000e+00> : vector<8x512xf32>
    %3 = tpu.matmul %1, %2, %cst {dimension_numbers = #tpu.dot_dimension_numbers<[1], [0], [0], [1], [0, 0, 1, 1], [], []>} : vector<8x16xbf16>, vector<16x512xbf16>, vector<8x512xf32> -> vector<8x512xf32>
    %c0_3 = arith.constant 0 : index
    %c0_4 = arith.constant 0 : index
    %4 = vector.load %arg3[%c0_3, %c0_4] : memref<1x512xf32, #tpu.memory_space<vmem>>, vector<1x512xf32>
    %5 = vector.broadcast %4 : vector<1x512xf32> to vector<8x512xf32>
    %6 = arith.addf %3, %5 : vector<8x512xf32>
    %cst_5 = arith.constant 0.000000e+00 : f32
    %7 = vector.broadcast %cst_5 : f32 to vector<8x512xf32>
    %8 = arith.maximumf %6, %7 : vector<8x512xf32>
    %9 = arith.truncf %8 : vector<8x512xf32> to vector<8x512xbf16>
    %c0_6 = arith.constant 0 : index
    %c0_7 = arith.constant 0 : index
    %10 = vector.load %arg4[%c0_6, %c0_7] : memref<512x384xbf16, #tpu.memory_space<vmem>>, vector<512x384xbf16>
    %cst_8 = arith.constant dense<0.000000e+00> : vector<8x384xf32>
    %11 = tpu.matmul %9, %10, %cst_8 {dimension_numbers = #tpu.dot_dimension_numbers<[1], [0], [0], [1], [0, 0, 1, 1], [], []>} : vector<8x512xbf16>, vector<512x384xbf16>, vector<8x384xf32> -> vector<8x384xf32>
    %c0_9 = arith.constant 0 : index
    %c0_10 = arith.constant 0 : index
    %12 = vector.load %arg5[%c0_9, %c0_10] : memref<1x384xf32, #tpu.memory_space<vmem>>, vector<1x384xf32>
    %13 = vector.broadcast %12 : vector<1x384xf32> to vector<8x384xf32>
    %14 = arith.addf %11, %13 : vector<8x384xf32>
    %cst_11 = arith.constant 0.000000e+00 : f32
    %15 = vector.broadcast %cst_11 : f32 to vector<8x384xf32>
    %16 = arith.maximumf %14, %15 : vector<8x384xf32>
    %17 = arith.truncf %16 : vector<8x384xf32> to vector<8x384xbf16>
    %c0_12 = arith.constant 0 : index
    %c0_13 = arith.constant 0 : index
    %18 = vector.load %arg6[%c0_12, %c0_13] : memref<384x128xbf16, #tpu.memory_space<vmem>>, vector<384x128xbf16>
    %cst_14 = arith.constant dense<0.000000e+00> : vector<8x128xf32>
    %19 = tpu.matmul %17, %18, %cst_14 {dimension_numbers = #tpu.dot_dimension_numbers<[1], [0], [0], [1], [0, 0, 1, 1], [], []>} : vector<8x384xbf16>, vector<384x128xbf16>, vector<8x128xf32> -> vector<8x128xf32>
    %c0_15 = arith.constant 0 : index
    %c0_16 = arith.constant 0 : index
    %20 = vector.load %arg7[%c0_15, %c0_16] : memref<1x128xf32, #tpu.memory_space<vmem>>, vector<1x128xf32>
    %21 = vector.broadcast %20 : vector<1x128xf32> to vector<8x128xf32>
    %22 = arith.addf %19, %21 : vector<8x128xf32>
    %23 = math.tanh %22 : vector<8x128xf32>
    %c0_17 = arith.constant 0 : index
    %c0_18 = arith.constant 0 : index
    %24 = vector.load %arg8[%c0_17, %c0_18] : memref<8x128xf32, #tpu.memory_space<vmem>>, vector<8x128xf32>
    tpu.vector_store %arg8[%c0_17, %c0_18], %23 {strides = array<i32>} : memref<8x128xf32, #tpu.memory_space<vmem>>, vector<8x128xf32>,
    return
  }
  func.func @transform_0(%arg0: i32) -> (i32, i32) {
    %c0_i32 = arith.constant 0 : i32
    %c0_i32_0 = arith.constant 0 : i32
    return %arg0, %c0_i32 : i32, i32
  }
  func.func @transform_1(%arg0: i32) -> (i32, i32) {
    %c0_i32 = arith.constant 0 : i32
    %c0_i32_0 = arith.constant 0 : i32
    %c0_i32_1 = arith.constant 0 : i32
    return %c0_i32, %c0_i32_0 : i32, i32
  }
  func.func @transform_2(%arg0: i32) -> (i32, i32) {
    %c0_i32 = arith.constant 0 : i32
    %c0_i32_0 = arith.constant 0 : i32
    %c0_i32_1 = arith.constant 0 : i32
    return %c0_i32, %c0_i32_0 : i32, i32
  }
  func.func @transform_3(%arg0: i32) -> (i32, i32) {
    %c0_i32 = arith.constant 0 : i32
    %c0_i32_0 = arith.constant 0 : i32
    %c0_i32_1 = arith.constant 0 : i32
    return %c0_i32, %c0_i32_0 : i32, i32
  }
  func.func @transform_4(%arg0: i32) -> (i32, i32) {
    %c0_i32 = arith.constant 0 : i32
    %c0_i32_0 = arith.constant 0 : i32
    %c0_i32_1 = arith.constant 0 : i32
    return %c0_i32, %c0_i32_0 : i32, i32
  }
  func.func @transform_5(%arg0: i32) -> (i32, i32) {
    %c0_i32 = arith.constant 0 : i32
    %c0_i32_0 = arith.constant 0 : i32
    %c0_i32_1 = arith.constant 0 : i32
    return %c0_i32, %c0_i32_0 : i32, i32
  }
  func.func @transform_6(%arg0: i32) -> (i32, i32) {
    %c0_i32 = arith.constant 0 : i32
    %c0_i32_0 = arith.constant 0 : i32
    %c0_i32_1 = arith.constant 0 : i32
    return %c0_i32, %c0_i32_0 : i32, i32
  }
  func.func @transform_7(%arg0: i32) -> (i32, i32) {
    %c0_i32 = arith.constant 0 : i32
    %c0_i32_0 = arith.constant 0 : i32
    return %arg0, %c0_i32 : i32, i32
  }
}

</mosaic_0001>

<bundles_post_ra>
// kernel: tpu_custom_call.1
= control target key start
LH: loop header
LB: loop body
LE: loop exit
PB: predicated region body
PF: predicated region fallthrough
CT: control target
= control target key end

     0   :  { %12 = vsyncpa [#allocation3], 0  ;;  %s2016_s0 = inlined_call_operand.hbm [shape: f32[8,16], index: 0, kind: input, shape index: {}]   ;;  %s2017_s1 = inlined_call_operand.hbm [shape: bf16[16,512], index: 1, kind: input, shape index: {}]   ;;  %s2018_s2 = inlined_call_operand.vmem [shape: f32[1,512], index: 2, kind: input, shape index: {}]   ;;  %s2019_s3 = inlined_call_operand.hbm [shape: bf16[512,384], index: 3, kind: input, shape index: {}]   ;;  %s2020_s4 = inlined_call_operand.vmem [shape: f32[1,384], index: 4, kind: input, shape index: {}]   ;;  %s2021_s5 = inlined_call_operand.hbm [shape: bf16[384,128], index: 5, kind: input, shape index: {}]   ;;  %s2022_s6 = inlined_call_operand.vmem [shape: f32[1,128], index: 6, kind: input, shape index: {}]   ;;  %s2023_s7 = inlined_call_operand.hbm [shape: f32[8,128], index: 7, kind: output, shape index: {}]  }
   0x1   :  { %13 = vsyncpa [#allocation6], 0 }
   0x2   :  { %14 = vsyncpa [#allocation9], 0 }
   0x3   :  { %15 = vsyncpa [#allocation4], 0  ;;  %s1866_s24 = smov [#allocation5]   ;;  %s1748_s28 = scalar_lea.hbm %s2017_s1, 512 }
   0x4   :  { %s31_s25 = sshll.u32 %s1866_s24, 4  ;;  %p1749_p0 = scmp.ne.s32.totalorder %s2017_s1, %s1748_s28  ;;  %s32_s25 = int_to_ptr.vmem [resolvable:$true] %s31_s25 }
   0x5   :  { %p1752_p1 = scmp.lt.u32.totalorder %s1748_s28, %s2017_s1 }
   0x7   :  { %p1754_p2 = pnand %p1752_p1, %p1749_p0 }
   0x9   :  { %1757 = shalt.err (!%p1754_p2)
}
   0xa   :  { %s1758_s10 = scalar_lea.vmem %s32_s25, 512  ;;  %p1763_p4 = scmp.lt.s32.totalorder %s32_s25, %s32_s25 }
   0xb   :  { %p1759_p3 = scmp.ne.s32.totalorder %s32_s25, %s1758_s10  ;;  %p1764_p5 = scmp.lt.s32.totalorder %s1758_s10, %s1758_s10 }
   0xd   :  { %p1765_p6 = por %p1764_p5, %p1763_p4 }
   0xf   :  { %p1766_p7 = pnand %p1765_p6, %p1759_p3 }
  0x11   :  { %1769 = shalt.err (!%p1766_p7)
}
  0x12   :  { %s1867_s11 = smov 256   ;;  %s1868_s12 = smov 16  }
  0x13   :  { %37 = dma.hbm_to_vmem [thread:$0]  %s2017_s1, 512, %s32_s25, [#allocation6], %s1867_s11, %s1867_s11, %s1868_s12  }
  0x14   :  { %s1869_s15 = smov [#allocation2]   ;;  %s1870_s17 = smov [#allocation7]  }
  0x15   :  { %s22_s16 = sshll.u32 %s1869_s15, 4  ;;  %s45_s18 = sshll.u32 %s1870_s17, 4  ;;  %s23_s16 = int_to_ptr.vmem [resolvable:$true] %s22_s16  ;;  %s46_s18 = int_to_ptr.vmem [resolvable:$true] %s45_s18 }
  0x16   :  { %s1770_s21 = scalar_lea.hbm %s2016_s0, 128 }
  0x17   :  { %p1771_p8 = scmp.ne.s32.totalorder %s2016_s0, %s1770_s21  ;;  %p1774_p9 = scmp.lt.u32.totalorder %s1770_s21, %s2016_s0 }
  0x19   :  { %p1776_p10 = pnand %p1774_p9, %p1771_p8 }
  0x1b   :  { %1779 = shalt.err (!%p1776_p10)
}
  0x1c   :  { %s1780_s1 = scalar_lea.vmem %s23_s16, 128  ;;  %p1785_p12 = scmp.lt.s32.totalorder %s23_s16, %s23_s16 }
  0x1d   :  { %p1781_p11 = scmp.ne.s32.totalorder %s23_s16, %s1780_s1  ;;  %p1786_p13 = scmp.lt.s32.totalorder %s1780_s1, %s1780_s1 }
  0x1f   :  { %p1787_p0 = por %p1786_p13, %p1785_p12 }
  0x21   :  { %p1788_p1 = pnand %p1787_p0, %p1781_p11 }
  0x23   :  { %1791 = shalt.err (!%p1788_p1)
}
  0x24   :  { %25 = dma.hbm_to_vmem [thread:$0]  %s2016_s0, 128, %s23_s16, [#allocation3]  }
  0x25   :  { %s1792_s30 = scalar_lea.hbm %s2019_s3, 12288 }
  0x26   :  { %p1793_p2 = scmp.ne.s32.totalorder %s2019_s3, %s1792_s30  ;;  %p1796_p3 = scmp.lt.u32.totalorder %s1792_s30, %s2019_s3 }
  0x28   :  { %p1798_p4 = pnand %p1796_p3, %p1793_p2 }
  0x2a   :  { %1801 = shalt.err (!%p1798_p4)
}
  0x2b   :  { %s1802_s12 = scalar_lea.vmem %s46_s18, 12288  ;;  %p1807_p6 = scmp.lt.s32.totalorder %s46_s18, %s46_s18 }
  0x2c   :  { %p1803_p5 = scmp.ne.s32.totalorder %s46_s18, %s1802_s12  ;;  %p1808_p7 = scmp.lt.s32.totalorder %s1802_s12, %s1802_s12 }
  0x2e   :  { %p1809_p8 = por %p1808_p7, %p1807_p6 }
  0x30   :  { %p1810_p9 = pnand %p1809_p8, %p1803_p5 }
  0x32   :  { %1813 = shalt.err (!%p1810_p9)
}
  0x33   :  { %s1871_s0 = smov 192   ;;  %s1872_s13 = smov 12  }
  0x34   :  { %51 = dma.hbm_to_vmem [thread:$0]  %s2019_s3, 12288, %s46_s18, [#allocation6], %s1871_s0, %s1871_s0, %s1872_s13  }
  0x35   :  { %s1873_s16 = smov [#allocation8]   ;;  %s1814_s21 = scalar_lea.hbm %s2021_s5, 3072 }
  0x36   :  { %s59_s17 = sshll.u32 %s1873_s16, 4  ;;  %p1815_p10 = scmp.ne.s32.totalorder %s2021_s5, %s1814_s21  ;;  %s60_s17 = int_to_ptr.vmem [resolvable:$true] %s59_s17 }
  0x37   :  { %p1818_p11 = scmp.lt.u32.totalorder %s1814_s21, %s2021_s5 }
  0x39   :  { %p1820_p12 = pnand %p1818_p11, %p1815_p10 }
  0x3b   :  { %1823 = shalt.err (!%p1820_p12)
}
  0x3c   :  { %s1824_s1 = scalar_lea.vmem %s60_s17, 3072  ;;  %p1829_p0 = scmp.lt.s32.totalorder %s60_s17, %s60_s17 }
  0x3d   :  { %p1825_p13 = scmp.ne.s32.totalorder %s60_s17, %s1824_s1  ;;  %p1830_p1 = scmp.lt.s32.totalorder %s1824_s1, %s1824_s1 }
  0x3f   :  { %p1831_p2 = por %p1830_p1, %p1829_p0 }
  0x41   :  { %p1832_p3 = pnand %p1831_p2, %p1825_p13 }
  0x43   :  { %1835 = shalt.err (!%p1832_p3)
}
  0x44   :  { %s1874_s3 = smov 64   ;;  %s1875_s18 = smov 4  }
  0x45   :  { %65 = dma.hbm_to_vmem [thread:$0]  %s2021_s5, 3072, %s60_s17, [#allocation9], %s1874_s3, %s1874_s3, %s1875_s18  }
  0x46   :  { %1858 = dma.done.wait [#allocation3], 128  }
  0x47   :  { %1859 = vsyncadd [#allocation3], 4294967168 }
  0x48   :  { %1860 = dma.done.wait [#allocation6], 12800  }
  0x49   :  { %1861 = vsyncadd [#allocation6], 4294954496 }
  0x4a   :  { %1862 = dma.done.wait [#allocation9], 3072  }
  0x4b   :  { %1863 = vsyncadd [#allocation9], 4294964224  ;;  %v1876_v0 = vmov 0   ;;  %v1588_v1 = vld [vmem:[#allocation5 + $0x4] ss:$16 sps:$4 sm:$0xff]   ;;  %v81_v3 = vld [vmem:[#allocation2] sm:$0xff]  ;;  %v89_v57 = vlaneseq }
  0x4c   :  { %165 = vmatprep.mubr.bf16.mxu0 %v1876_v0  ;;  %206 = vmatprep.mubr.bf16.mxu1 %v1876_v0  ;;  %v1590_v2 = vld [vmem:[#allocation5] ss:$16 sps:$4 sm:$0xff]   ;;  %v82_v4 = vpack.c.bf16 %v81_v3, %v81_v3  ;;  %v1591_v5 = vld [vmem:[#allocation5 + $0xc] ss:$16 sps:$4 sm:$0xff]   ;;  %v1593_v6 = vld [vmem:[#allocation5 + $0x8] ss:$16 sps:$4 sm:$0xff]  }
  0x4d   :  { %133 = vmatprep.subr.bf16.mxu0 %v1588_v1  ;;  %vm129_vm0 = vcmask 130048   ;;  %v1594_v7 = vld [vmem:[#allocation7] ss:$12 sps:$4 sm:$0xff]   ;;  %174 = vmatprep.subr.bf16.mxu1 %v1591_v5  ;;  %v1596_v8 = vld [vmem:[#allocation7 + $0x4] ss:$12 sps:$4 sm:$0xff]   ;;  %v1968_v58 = vshrl.u32 %v89_v57, 7 }
  0x4e   :  { %134 = vmatpush1.bf16.msra.mxu0 %v1590_v2  ;;  %175 = vmatpush1.bf16.msra.mxu1 %v1593_v6  ;;  %v1599_v9 = vld [vmem:[#allocation7 + $0x1c] ss:$12 sps:$4 sm:$0xff]   ;;  %v1597_v10 = vld [vmem:[#allocation7 + $0x18] ss:$12 sps:$4 sm:$0xff]   ;;  %v1602_v11 = vld [vmem:[#allocation7 + $0x34] ss:$12 sps:$4 sm:$0xff]  }
  0x4f   :  { %880 = vmatprep.subr.bf16.mxu0 %v1596_v8  ;;  %v1600_v12 = vld [vmem:[#allocation7 + $0x30] ss:$12 sps:$4 sm:$0xff]   ;;  %v1605_v13 = vld [vmem:[#allocation7 + $0x4c] ss:$12 sps:$4 sm:$0xff]   ;;  %v1603_v14 = vld [vmem:[#allocation7 + $0x48] ss:$12 sps:$4 sm:$0xff]  }
  0x50   :  { %v1608_v15 = vld [vmem:[#allocation7 + $0x64] ss:$12 sps:$4 sm:$0xff]   ;;  %v1621_v16 = vld [vmem:[#allocation7 + $0xc8] ss:$12 sps:$4 sm:$0xff]   ;;  %v1606_v18 = vld [vmem:[#allocation7 + $0x60] ss:$12 sps:$4 sm:$0xff]  }
  0x51   :  { %1350 = vmatmul.mubr.msk.bf16.vlgmr.msra.gmra.mrb[0].mxu0 %vm129_vm0, %v82_v4  ;;  %1351 = vmatmul.mubr.msk.bf16.vlgmr.msra.gmra.mrb[0].mxu1 %vm129_vm0, %v82_v4  ;;  %v1622_v17 = vld [vmem:[#allocation7 + $0x8] ss:$12 sps:$4 sm:$0xff]   ;;  %v1626_v20 = vld [vmem:[#allocation7 + $0xe0] ss:$12 sps:$4 sm:$0xff]   ;;  %v1609_v22 = vld [vmem:[#allocation7 + $0x78] ss:$12 sps:$4 sm:$0xff]  }
  0x52   :  { %881 = vmatpush1.bf16.msra.mxu0 %v1594_v7  ;;  %1473 = vmatprep.subr.bf16.mxu1 %v1621_v16  ;;  %v1611_v19 = vld [vmem:[#allocation7 + $0x7c] ss:$12 sps:$4 sm:$0xff]   ;;  %v1627_v21 = vld [vmem:[#allocation7 + $0x20] ss:$12 sps:$4 sm:$0xff]   ;;  %v1631_v23 = vld [vmem:[#allocation7 + $0xf8] ss:$12 sps:$4 sm:$0xff]  }
  0x53   :  { %882 = vmatprep.subr.bf16.mxu0 %v1599_v9  ;;  %1474 = vmatpush3.bf16.msra.mxu1 %v1622_v17  ;;  %v1632_v24 = vld [vmem:[#allocation7 + $0x38] ss:$12 sps:$4 sm:$0xff]   ;;  %v1614_v25 = vld [vmem:[#allocation7 + $0x94] ss:$12 sps:$4 sm:$0xff]   ;;  %v1636_v26 = vld [vmem:[#allocation7 + $0x110] ss:$12 sps:$4 sm:$0xff]  }
  0x54   :  { %1475 = vmatprep.subr.bf16.mxu1 %v1626_v20  ;;  %v1637_v27 = vld [vmem:[#allocation7 + $0x50] ss:$12 sps:$4 sm:$0xff]   ;;  %v1617_v29 = vld [vmem:[#allocation7 + $0xac] ss:$12 sps:$4 sm:$0xff]   ;;  %v1641_v30 = vld [vmem:[#allocation7 + $0x128] ss:$12 sps:$4 sm:$0xff]  }
  0x55   :  { %v1612_v28 = vld [vmem:[#allocation7 + $0x90] ss:$12 sps:$4 sm:$0xff]   ;;  %v1642_v31 = vld [vmem:[#allocation7 + $0x68] ss:$12 sps:$4 sm:$0xff]   ;;  %v1646_v34 = vld [vmem:[#allocation7 + $0x140] ss:$12 sps:$4 sm:$0xff]  }
  0x56   :  { %883 = vmatpush1.bf16.msra.mxu0 %v1597_v10  ;;  %v1615_v32 = vld [vmem:[#allocation7 + $0xa8] ss:$12 sps:$4 sm:$0xff]   ;;  %v1620_v33 = vld [vmem:[#allocation7 + $0xc4] ss:$12 sps:$4 sm:$0xff]   ;;  %v1618_v35 = vld [vmem:[#allocation7 + $0xc0] ss:$12 sps:$4 sm:$0xff]  }
  0x57   :  { %884 = vmatprep.subr.bf16.mxu0 %v1602_v11  ;;  %1476 = vmatpush3.bf16.msra.mxu1 %v1627_v21  ;;  %v1647_v36 = vld [vmem:[#allocation7 + $0x80] ss:$12 sps:$4 sm:$0xff]   ;;  %v1625_v37 = vld [vmem:[#allocation7 + $0xdc] ss:$12 sps:$4 sm:$0xff]   ;;  %v1623_v38 = vld [vmem:[#allocation7 + $0xd8] ss:$12 sps:$4 sm:$0xff]  }
  0x58   :  { %1477 = vmatprep.subr.bf16.mxu1 %v1631_v23  ;;  %v1630_v39 = vld [vmem:[#allocation7 + $0xf4] ss:$12 sps:$4 sm:$0xff]   ;;  %v1628_v40 = vld [vmem:[#allocation7 + $0xf0] ss:$12 sps:$4 sm:$0xff]   ;;  %v1635_v41 = vld [vmem:[#allocation7 + $0x10c] ss:$12 sps:$4 sm:$0xff]  }
  0x59   :  { %v1633_v42 = vld [vmem:[#allocation7 + $0x108] ss:$12 sps:$4 sm:$0xff]   ;;  %v1640_v43 = vld [vmem:[#allocation7 + $0x124] ss:$12 sps:$4 sm:$0xff]   ;;  %v1638_v44 = vld [vmem:[#allocation7 + $0x120] ss:$12 sps:$4 sm:$0xff]  }
  0x5a   :  { %885 = vmatpush1.bf16.msra.mxu0 %v1600_v12  ;;  %v1645_v45 = vld [vmem:[#allocation7 + $0x13c] ss:$12 sps:$4 sm:$0xff]   ;;  %v1643_v46 = vld [vmem:[#allocation7 + $0x138] ss:$12 sps:$4 sm:$0xff]   ;;  %v1650_v47 = vld [vmem:[#allocation7 + $0x154] ss:$12 sps:$4 sm:$0xff]  }
  0x5b   :  { %886 = vmatprep.subr.bf16.mxu0 %v1605_v13  ;;  %1478 = vmatpush3.bf16.msra.mxu1 %v1632_v24  ;;  %v1651_v48 = vld [vmem:[#allocation7 + $0x158] ss:$12 sps:$4 sm:$0xff]   ;;  %v1648_v49 = vld [vmem:[#allocation7 + $0x150] ss:$12 sps:$4 sm:$0xff]   ;;  %v1653_v53 = vld [vmem:[#allocation7 + $0x168] ss:$12 sps:$4 sm:$0xff]  }
  0x5c   :  { %1479 = vmatprep.subr.bf16.mxu1 %v1636_v26  ;;  %v1652_v50 = vld [vmem:[#allocation7 + $0x98] ss:$12 sps:$4 sm:$0xff]   ;;  %v1656_v52 = vld [vmem:[#allocation7 + $0x170] ss:$12 sps:$4 sm:$0xff]   ;;  %v1661_v56 = vld [vmem:[#allocation7 + $0x248] ss:$12 sps:$4 sm:$0xff]  }
  0x5d   :  { %v1655_v51 = vld [vmem:[#allocation7 + $0x16c] ss:$12 sps:$4 sm:$0xff]   ;;  %v1657_v54 = vld [vmem:[#allocation7 + $0xb0] ss:$12 sps:$4 sm:$0xff]   ;;  %v91_v59 = vsub.s32 0, %v1968_v58  ;;  %v95_v61 = vsub.s32 1, %v1968_v58 }
  0x5e   :  { %887 = vmatpush1.bf16.msra.mxu0 %v1603_v14  ;;  %v1660_v55 = vld [vmem:[#allocation7 + $0x184] ss:$12 sps:$4 sm:$0xff]   ;;  %v1974_v60 = vld [vmem:[%s2018_s2] sm:$0xf]  ;;  %v103_v62 = vsub.s32 3, %v1968_v58  ;;  %vm1878_vm1 = vmmov 0  }
  0x5f   :  { %888 = vmatprep.subr.bf16.mxu0 %v1608_v15  ;;  %1480 = vmatpush3.bf16.msra.mxu1 %v1637_v27  ;;  %v92_v63 = vrot.slane %v1974_v60, %v91_v59  ;;  %v96_v0 = vrot.slane %v1974_v60, %v95_v61  ;;  %v1658_v16 = vld [vmem:[#allocation7 + $0x180] ss:$12 sps:$4 sm:$0xff]   ;;  %v1662_v17 = vld [vmem:[#allocation7 + $0x188] ss:$12 sps:$4 sm:$0xff]   ;;  %v1663_v23 = vld [vmem:[#allocation7 + $0x198] ss:$12 sps:$4 sm:$0xff]  }
  0x60   :  { %1481 = vmatprep.subr.bf16.mxu1 %v1641_v30  ;;  %v104_v2 = vrot.slane %v1974_v60, %v103_v62  ;;  %v1665_v20 = vld [vmem:[#allocation7 + $0x19c] ss:$12 sps:$4 sm:$0xff]   ;;  %v1666_v21 = vld [vmem:[#allocation7 + $0x260] ss:$12 sps:$4 sm:$0xff]   ;;  %v1671_v26 = vld [vmem:[#allocation7 + $0x278] ss:$12 sps:$4 sm:$0xff]  }
  0x61   :  { %v1667_v24 = vld [vmem:[#allocation7 + $0x1a0] ss:$12 sps:$4 sm:$0xff]   ;;  %v1668_v27 = vld [vmem:[#allocation7 + $0x1b0] ss:$12 sps:$4 sm:$0xff]   ;;  %v1701_v57 = vld [vmem:[#allocation7 + $0x258] ss:$12 sps:$4 sm:$0xff]  }
  0x62   :  { %889 = vmatpush1.bf16.msra.mxu0 %v1606_v18  ;;  %v1676_v30 = vld [vmem:[#allocation7 + $0x290] ss:$12 sps:$4 sm:$0xff]   ;;  %s1879_s8 = smov [#allocation10]  }
  0x63   :  { %890 = vmatprep.subr.bf16.mxu0 %v1611_v19  ;;  %1482 = vmatpush3.bf16.msra.mxu1 %v1642_v31  ;;  %v1673_v31 = vld [vmem:[#allocation7 + $0x1c8] ss:$12 sps:$4 sm:$0xff]   ;;  %v1704_v62 = vld [vmem:[#allocation7 + $0x270] ss:$12 sps:$4 sm:$0xff]   ;;  %s1335_s9 = sshll.u32 %s1879_s8, 4  ;;  %s1336_s9 = int_to_ptr.vmem [resolvable:$true] %s1335_s9 }
  0x64   :  { %1483 = vmatprep.subr.bf16.mxu1 %v1646_v34  ;;  %v1681_v34 = vld [vmem:[#allocation7 + $0x2a8] ss:$12 sps:$4 sm:$0xff]   ;;  %s1836_s10 = scalar_lea.vmem %s1336_s9, 128  ;;  %p1841_p5 = scmp.lt.s32.totalorder %s1336_s9, %s1336_s9 }
  0x65   :  { %p1837_p4 = scmp.ne.s32.totalorder %s1336_s9, %s1836_s10  ;;  %p1842_p6 = scmp.lt.s32.totalorder %s1836_s10, %s1836_s10 }
  0x66   :  { %891 = vmatpush1.bf16.msra.mxu0 %v1609_v22 }
  0x67   :  { %892 = vmatprep.subr.bf16.mxu0 %v1614_v25  ;;  %1484 = vmatpush3.bf16.msra.mxu1 %v1647_v36  ;;  %v1670_v25 = vld [vmem:[#allocation7 + $0x1b4] ss:$12 sps:$4 sm:$0xff]   ;;  %p1843_p7 = por %p1842_p6, %p1841_p5 }
  0x68   :  { %1485 = vmatprep.subr.bf16.mxu1 %v1651_v48  ;;  %v1678_v36 = vld [vmem:[#allocation7 + $0x1e0] ss:$12 sps:$4 sm:$0xff]  }
  0x69   :  { %v1695_v48 = vld [vmem:[#allocation7 + $0x22c] ss:$12 sps:$4 sm:$0xff]   ;;  %p1844_p8 = pnand %p1843_p7, %p1837_p4 }
  0x6a   :  { %893 = vmatpush1.bf16.msra.mxu0 %v1612_v28  ;;  %v1672_v28 = vld [vmem:[#allocation7 + $0x1b8] ss:$12 sps:$4 sm:$0xff]  }
  0x6b   :  { %894 = vmatprep.subr.bf16.mxu0 %v1617_v29  ;;  %1486 = vmatpush3.bf16.msra.mxu1 %v1652_v50  ;;  %v1675_v29 = vld [vmem:[#allocation7 + $0x1cc] ss:$12 sps:$4 sm:$0xff]  }
  0x6c   :  { %1487 = vmatprep.subr.bf16.mxu1 %v1656_v52  ;;  %v1697_v52 = vld [vmem:[#allocation7 + $0x230] ss:$12 sps:$4 sm:$0xff]  }
  0x6e   :  { %895 = vmatpush1.bf16.msra.mxu0 %v1615_v32  ;;  %v1677_v32 = vld [vmem:[#allocation7 + $0x1d0] ss:$12 sps:$4 sm:$0xff]  }
  0x6f   :  { %896 = vmatprep.subr.bf16.mxu0 %v1620_v33  ;;  %1488 = vmatpush3.bf16.msra.mxu1 %v1657_v54  ;;  %v1680_v33 = vld [vmem:[#allocation7 + $0x1e4] ss:$12 sps:$4 sm:$0xff]  }
  0x70   :  { %1495 = vmatprep.subr.bf16.mxu1 %v1661_v56  ;;  %v1703_v56 = vld [vmem:[#allocation7 + $0x25c] ss:$12 sps:$4 sm:$0xff]  }
  0x72   :  { %897 = vmatpush1.bf16.msra.mxu0 %v1618_v35  ;;  %v99_v35 = vsub.s32 2, %v1968_v58  ;;  %v1740_v58 = vld [vmem:[#allocation8 + $0x90] sm:$0xff]  }
  0x73   :  { %898 = vmatprep.subr.bf16.mxu0 %v1625_v37  ;;  %v1682_v37 = vld [vmem:[#allocation7 + $0x1e8] ss:$12 sps:$4 sm:$0xff]  }
  0x76   :  { %899 = vmatpush1.bf16.msra.mxu0 %v1623_v38  ;;  %v1685_v38 = vld [vmem:[#allocation7 + $0x1fc] ss:$12 sps:$4 sm:$0xff]  }
  0x77   :  { %900 = vmatprep.subr.bf16.mxu0 %v1630_v39  ;;  %v1686_v39 = vld [vmem:[#allocation7 + $0x2c0] ss:$12 sps:$4 sm:$0xff]  }
  0x7a   :  { %901 = vmatpush1.bf16.msra.mxu0 %v1628_v40  ;;  %v100_v40 = vrot.slane %v1974_v60, %v99_v35  ;;  %v1706_v60 = vld [vmem:[#allocation7 + $0x274] ss:$12 sps:$4 sm:$0xff]  }
  0x7b   :  { %902 = vmatprep.subr.bf16.mxu0 %v1635_v41  ;;  %v1683_v41 = vld [vmem:[#allocation7 + $0x1f8] ss:$12 sps:$4 sm:$0xff]  }
  0x7e   :  { %903 = vmatpush1.bf16.msra.mxu0 %v1633_v42  ;;  %v1687_v42 = vld [vmem:[#allocation7 + $0x200] ss:$12 sps:$4 sm:$0xff]  }
  0x7f   :  { %904 = vmatprep.subr.bf16.mxu0 %v1640_v43  ;;  %v1690_v43 = vld [vmem:[#allocation7 + $0x214] ss:$12 sps:$4 sm:$0xff]  }
  0x82   :  { %905 = vmatpush1.bf16.msra.mxu0 %v1638_v44  ;;  %v1691_v44 = vld [vmem:[#allocation7 + $0x2d8] ss:$12 sps:$4 sm:$0xff]  }
  0x83   :  { %906 = vmatprep.subr.bf16.mxu0 %v1645_v45 }
  0x86   :  { %907 = vmatpush1.bf16.msra.mxu0 %v1643_v46  ;;  %v1688_v46 = vld [vmem:[#allocation7 + $0x210] ss:$12 sps:$4 sm:$0xff]  }
  0x87   :  { %908 = vmatprep.subr.bf16.mxu0 %v1650_v47  ;;  %v1692_v47 = vld [vmem:[#allocation7 + $0x218] ss:$12 sps:$4 sm:$0xff]  }
  0x8a   :  { %909 = vmatpush1.bf16.msra.mxu0 %v1648_v49  ;;  %v1696_v49 = vld [vmem:[#allocation7 + $0x2f0] ss:$12 sps:$4 sm:$0xff]  }
  0x8b   :  { %910 = vmatprep.subr.bf16.mxu0 %v1655_v51  ;;  %v1693_v51 = vld [vmem:[#allocation7 + $0x228] ss:$12 sps:$4 sm:$0xff]  }
  0x8e   :  { %911 = vmatpush1.bf16.msra.mxu0 %v1653_v53  ;;  %v1700_v53 = vld [vmem:[#allocation7 + $0x244] ss:$12 sps:$4 sm:$0xff]  }
  0x8f   :  { %921 = vmatprep.subr.bf16.mxu0 %v1660_v55  ;;  %v1698_v55 = vld [vmem:[#allocation7 + $0x240] ss:$12 sps:$4 sm:$0xff]  }
 0x124   :  { %v167_v1 = vpop.f32.mrb[0].mxu0  ;;  %v1985_v7 = vpop.f32.mrb[0].mxu1 }
 0x125   :  { %v168_v3 = vadd.f32 %v167_v1, %v92_v63  ;;  %v169_v4 = vpop.f32.mrb[1].mxu0  ;;  %v210_v10 = vpop.f32.mrb[1].mxu1  ;;  %v209_v45 = vadd.f32 %v1985_v7, %v100_v40  ;;  %v1709_v63 = vld [vmem:[#allocation7 + $0x28c] ss:$12 sps:$4 sm:$0xff]   ;;  %v1712_v1 = vld [vmem:[#allocation7 + $0x2a4] ss:$12 sps:$4 sm:$0xff]  }
 0x126   :  { %v170_v5 = vadd.f32 %v169_v4, %v96_v0  ;;  %v171_v6 = vpop.f32.mrb[2].mxu0  ;;  %v211_v12 = vadd.f32 %v210_v10, %v104_v2  ;;  %v212_v13 = vpop.f32.mrb[2].mxu1  ;;  %v1707_v0 = vld [vmem:[#allocation7 + $0x288] ss:$12 sps:$4 sm:$0xff]   ;;  %v1710_v2 = vld [vmem:[#allocation7 + $0x2a0] ss:$12 sps:$4 sm:$0xff]  }
 0x127   :  { %v215_v8 = vmax.f32 %v168_v3, 0.0  ;;  %v172_v9 = vpop.f32.mrb[3].mxu0  ;;  %v213_v14 = vpop.f32.mrb[3].mxu1  ;;  %v217_v50 = vmax.f32 %v209_v45, 0.0  ;;  %v1715_v3 = vld [vmem:[#allocation7 + $0x2bc] ss:$12 sps:$4 sm:$0xff]  }
 0x128   :  { %v216_v11 = vmax.f32 %v170_v5, 0.0  ;;  %v218_v18 = vmax.f32 %v211_v12, 0.0  ;;  %v1713_v4 = vld [vmem:[#allocation7 + $0x2b8] ss:$12 sps:$4 sm:$0xff]   ;;  %v1718_v5 = vld [vmem:[#allocation7 + $0x2d4] ss:$12 sps:$4 sm:$0xff]  }
 0x129   :  { %v219_v19 = vpack.c.bf16 %v215_v8, %v215_v8  ;;  %v221_v54 = vpack.c.bf16 %v217_v50, %v217_v50  ;;  %v1716_v6 = vld [vmem:[#allocation7 + $0x2d0] ss:$12 sps:$4 sm:$0xff]   ;;  %v1721_v7 = vld [vmem:[#allocation7 + $0x2ec] ss:$12 sps:$4 sm:$0xff]   ;;  %v1719_v8 = vld [vmem:[#allocation7 + $0x2e8] ss:$12 sps:$4 sm:$0xff]  }
 0x12a   :  { %v220_v15 = vpack.c.bf16 %v216_v11, %v216_v11  ;;  %v222_v22 = vpack.c.bf16 %v218_v18, %v218_v18  ;;  %v1722_v9 = vld [vmem:[#allocation8 + $0x40] sm:$0xff]   ;;  %v1724_v11 = vld [vmem:[#allocation8 + $0x48] sm:$0xff]   ;;  %v1726_v13 = vld [vmem:[#allocation8 + $0x50] sm:$0xff]  }
 0x12b   :  { %v1723_v10 = vld [vmem:[#allocation8] sm:$0xff]   ;;  %v1725_v12 = vld [vmem:[#allocation8 + $0x8] sm:$0xff]   ;;  %v1727_v14 = vld [vmem:[#allocation8 + $0x10] sm:$0xff]  }
 0x12c   :  { %912 = vmatprep.mubr.bf16.mxu0 %v220_v15  ;;  %994 = vmatprep.mubr.bf16.mxu1 %v220_v15  ;;  %v1728_v15 = vld [vmem:[#allocation8 + $0x58] sm:$0xff]   ;;  %v1731_v18 = vld [vmem:[#allocation8 + $0x20] sm:$0xff]  }
 0x12d   :  { %913 = vmatmul.mubr.bf16.vlgmr.msra.gmra.mrb[4].mxu0 %v219_v19  ;;  %995 = vmatmul.mubr.bf16.vlgmr.msra.gmra.mrb[4].mxu1 %v219_v19  ;;  %v1732_v19 = vld [vmem:[#allocation8 + $0x68] sm:$0xff]  }
 0x12e   :  { %922 = vmatpush1.bf16.msra.mxu0 %v1658_v16  ;;  %1496 = vmatpush3.bf16.msra.mxu1 %v1662_v17  ;;  %v1729_v16 = vld [vmem:[#allocation8 + $0x18] sm:$0xff]   ;;  %v1730_v17 = vld [vmem:[#allocation8 + $0x60] sm:$0xff]  }
 0x12f   :  { %923 = vmatprep.subr.bf16.mxu0 %v1665_v20  ;;  %1497 = vmatprep.subr.bf16.mxu1 %v1666_v21  ;;  %v1733_v20 = vld [vmem:[#allocation8 + $0x28] sm:$0xff]   ;;  %v1734_v21 = vld [vmem:[#allocation8 + $0x70] sm:$0xff]  }
 0x130   :  { %1034 = vmatprep.mubr.bf16.mxu1 %v222_v22  ;;  %953 = vmatprep.mubr.bf16.mxu0 %v222_v22  ;;  %v1735_v22 = vld [vmem:[#allocation8 + $0x30] sm:$0xff]  }
 0x132   :  { %924 = vmatpush1.bf16.msra.mxu0 %v1663_v23  ;;  %1498 = vmatpush3.bf16.msra.mxu1 %v1667_v24  ;;  %v1736_v23 = vld [vmem:[#allocation8 + $0x78] sm:$0xff]  }
 0x133   :  { %925 = vmatprep.subr.bf16.mxu0 %v1670_v25  ;;  %1499 = vmatprep.subr.bf16.mxu1 %v1671_v26  ;;  %v1737_v24 = vld [vmem:[#allocation8 + $0x38] sm:$0xff]   ;;  %v1877_v25 = vmov 0.0  }
 0x136   :  { %926 = vmatpush1.bf16.msra.mxu0 %v1668_v27  ;;  %1500 = vmatpush3.bf16.msra.mxu1 %v1672_v28 }
 0x137   :  { %927 = vmatprep.subr.bf16.mxu0 %v1675_v29  ;;  %1501 = vmatprep.subr.bf16.mxu1 %v1676_v30 }
 0x13a   :  { %928 = vmatpush1.bf16.msra.mxu0 %v1673_v31  ;;  %1502 = vmatpush3.bf16.msra.mxu1 %v1677_v32  ;;  %v351_v31 = vld [vmem:[%s2020_s4] sm:$0x7] }
 0x13b   :  { %929 = vmatprep.subr.bf16.mxu0 %v1680_v33  ;;  %1503 = vmatprep.subr.bf16.mxu1 %v1681_v34  ;;  %v364_v32 = vrot.slane %v351_v31, %v99_v35 }
 0x13e   :  { %930 = vmatpush1.bf16.msra.mxu0 %v1678_v36  ;;  %1504 = vmatpush3.bf16.msra.mxu1 %v1682_v37 }
 0x13f   :  { %931 = vmatprep.subr.bf16.mxu0 %v1685_v38  ;;  %1505 = vmatprep.subr.bf16.mxu1 %v1686_v39 }
 0x142   :  { %932 = vmatpush1.bf16.msra.mxu0 %v1683_v41  ;;  %1506 = vmatpush3.bf16.msra.mxu1 %v1687_v42  ;;  %v356_v41 = vrot.slane %v351_v31, %v91_v59  ;;  %v360_v42 = vrot.slane %v351_v31, %v95_v61  ;;  %v1741_v59 = vld [vmem:[#allocation8 + $0x98] sm:$0xff]   ;;  %v1742_v61 = vld [vmem:[#allocation8 + $0xa0] sm:$0xff]  }
 0x143   :  { %933 = vmatprep.subr.bf16.mxu0 %v1690_v43  ;;  %1507 = vmatprep.subr.bf16.mxu1 %v1691_v44 }
 0x146   :  { %934 = vmatpush1.bf16.msra.mxu0 %v1688_v46  ;;  %1508 = vmatpush3.bf16.msra.mxu1 %v1692_v47 }
 0x147   :  { %935 = vmatprep.subr.bf16.mxu0 %v1695_v48  ;;  %1509 = vmatprep.subr.bf16.mxu1 %v1696_v49 }
 0x14a   :  { %936 = vmatpush1.bf16.msra.mxu0 %v1693_v51  ;;  %1510 = vmatpush3.bf16.msra.mxu1 %v1697_v52  ;;  %v1738_v51 = vld [vmem:[#allocation8 + $0x80] sm:$0xff]  }
 0x14b   :  { %937 = vmatprep.subr.bf16.mxu0 %v1700_v53  ;;  %1517 = vmatprep.subr.bf16.mxu1 %v1722_v9  ;;  %v1739_v53 = vld [vmem:[#allocation8 + $0x88] sm:$0xff]  }
 0x14d   :  { %1035 = vmatmul.mubr.bf16.vlgmr.msra.gmra.mrb[8].mxu1 %v221_v54 }
 0x14e   :  { %938 = vmatpush1.bf16.msra.mxu0 %v1698_v55  ;;  %1518 = vmatpush3.bf16.msra.mxu1 %v1723_v10  ;;  %v1744_v55 = vld [vmem:[#allocation8 + $0xb0] sm:$0xff]  }
 0x14f   :  { %939 = vmatprep.subr.bf16.mxu0 %v1703_v56  ;;  %1519 = vmatprep.subr.bf16.mxu1 %v1724_v11  ;;  %v1745_v56 = vld [vmem:[#allocation8 + $0xb8] sm:$0xff]  }
 0x152   :  { %940 = vmatpush1.bf16.msra.mxu0 %v1701_v57  ;;  %1520 = vmatpush3.bf16.msra.mxu1 %v1725_v12 }
 0x153   :  { %941 = vmatprep.subr.bf16.mxu0 %v1706_v60  ;;  %1521 = vmatprep.subr.bf16.mxu1 %v1726_v13 }
 0x156   :  { %942 = vmatpush1.bf16.msra.mxu0 %v1704_v62  ;;  %1522 = vmatpush3.bf16.msra.mxu1 %v1727_v14 }
 0x157   :  { %943 = vmatprep.subr.bf16.mxu0 %v1709_v63  ;;  %1523 = vmatprep.subr.bf16.mxu1 %v1728_v15 }
 0x15a   :  { %944 = vmatpush1.bf16.msra.mxu0 %v1707_v0  ;;  %1524 = vmatpush3.bf16.msra.mxu1 %v1729_v16 }
 0x15b   :  { %945 = vmatprep.subr.bf16.mxu0 %v1712_v1  ;;  %1525 = vmatprep.subr.bf16.mxu1 %v1730_v17 }
 0x15e   :  { %946 = vmatpush1.bf16.msra.mxu0 %v1710_v2  ;;  %1526 = vmatpush3.bf16.msra.mxu1 %v1731_v18 }
 0x15f   :  { %947 = vmatprep.subr.bf16.mxu0 %v1715_v3  ;;  %1527 = vmatprep.subr.bf16.mxu1 %v1732_v19  ;;  %v1448_v3 = vld [vmem:[%s2022_s6] ss:$0 sm:$0xff] }
 0x162   :  { %948 = vmatpush1.bf16.msra.mxu0 %v1713_v4  ;;  %1528 = vmatpush3.bf16.msra.mxu1 %v1733_v20 }
 0x163   :  { %949 = vmatprep.subr.bf16.mxu0 %v1718_v5  ;;  %1529 = vmatprep.subr.bf16.mxu1 %v1734_v21 }
 0x166   :  { %950 = vmatpush1.bf16.msra.mxu0 %v1716_v6  ;;  %1530 = vmatpush3.bf16.msra.mxu1 %v1735_v22 }
 0x167   :  { %951 = vmatprep.subr.bf16.mxu0 %v1721_v7  ;;  %1531 = vmatprep.subr.bf16.mxu1 %v1736_v23 }
 0x16a   :  { %952 = vmatpush1.bf16.msra.mxu0 %v1719_v8  ;;  %1532 = vmatpush3.bf16.msra.mxu1 %v1737_v24 }
 0x16b   :  { %1548 = vmatprep.subr.bf16.mxu1 %v1877_v25 }
 0x16d   :  { %954 = vmatmul.mubr.bf16.vlgmr.msra.gmra.mrb[4].mxu0 %v221_v54  ;;  %v1743_v54 = vld [vmem:[#allocation8 + $0xa8] sm:$0xff]  }
 0x200   :  { %v1489_v26 = vpop.f32.mrb[4].mxu1 }
 0x201   :  { %v1490_v27 = vpop.f32.mrb[5].mxu1 }
 0x202   :  { %v1491_v28 = vadd.f32 %v1490_v27, %v1489_v26  ;;  %v1492_v29 = vpop.f32.mrb[6].mxu1 }
 0x203   :  { %v1493_v30 = vpop.f32.mrb[7].mxu1 }
 0x204   :  { %v997_v36 = vadd.f32 %v1491_v28, %v364_v32 }
 0x220   :  { %v1511_v33 = vpop.f32.mrb[8].mxu1 }
 0x221   :  { %v1512_v34 = vpop.f32.mrb[9].mxu1 }
 0x222   :  { %v1513_v37 = vadd.f32 %v1512_v34, %v1511_v33  ;;  %v1514_v38 = vpop.f32.mrb[10].mxu1 }
 0x223   :  { %v1515_v39 = vpop.f32.mrb[11].mxu1 }
 0x224   :  { %v1037_v40 = vadd.f32 %v1513_v37, %v997_v36 }
 0x226   :  { %v1044_v57 = vmax.f32 %v1037_v40, 0.0 }
 0x228   :  { %v1047_v60 = vpack.c.bf16 %v1044_v57, %v1044_v57 }
 0x240   :  { %v955_v43 = vpop.f32.mrb[4].mxu0 }
 0x241   :  { %v1568_v44 = vadd.f32 %v955_v43, %v356_v41  ;;  %v957_v45 = vpop.f32.mrb[5].mxu0 }
 0x242   :  { %v1569_v46 = vadd.f32 %v957_v45, %v360_v42  ;;  %v959_v47 = vpop.f32.mrb[6].mxu0 }
 0x243   :  { %v1042_v48 = vmax.f32 %v1568_v44, 0.0  ;;  %v960_v35 = vpop.f32.mrb[7].mxu0 }
 0x244   :  { %v1043_v49 = vmax.f32 %v1569_v46, 0.0 }
 0x245   :  { %v1045_v52 = vpack.c.bf16 %v1042_v48, %v1042_v48 }
 0x246   :  { %v1046_v50 = vpack.c.bf16 %v1043_v49, %v1043_v49 }
 0x248   :  { %1279 = vmatprep.mubr.bf16.mxu1 %v1046_v50 }
 0x249   :  { %1280 = vmatmul.mubr.bf16.vlgmr.msra.gmra.mrb[12].mxu1 %v1045_v52 }
 0x24a   :  { %1549 = vmatpush3.bf16.msra.mxu1 %v1738_v51  ;;  %1564 = vmatprep.mubr.msk.bf16.mxu1 %vm1878_vm1, %v1877_v25 }
 0x24b   :  { %1550 = vmatprep.subr.bf16.mxu1 %v1877_v25 }
 0x24e   :  { %1551 = vmatpush3.bf16.msra.mxu1 %v1739_v53 }
 0x24f   :  { %1552 = vmatprep.subr.bf16.mxu1 %v1877_v25 }
 0x252   :  { %1553 = vmatpush3.bf16.msra.mxu1 %v1740_v58 }
 0x253   :  { %1554 = vmatprep.subr.bf16.mxu1 %v1877_v25 }
 0x256   :  { %1555 = vmatpush3.bf16.msra.mxu1 %v1741_v59 }
 0x257   :  { %1556 = vmatprep.subr.bf16.mxu1 %v1877_v25 }
 0x25a   :  { %1557 = vmatpush3.bf16.msra.mxu1 %v1742_v61 }
 0x25b   :  { %1558 = vmatprep.subr.bf16.mxu1 %v1877_v25 }
 0x25e   :  { %1559 = vmatpush3.bf16.msra.mxu1 %v1743_v54 }
 0x25f   :  { %1560 = vmatprep.subr.bf16.mxu1 %v1877_v25 }
 0x262   :  { %1561 = vmatpush3.bf16.msra.mxu1 %v1744_v55 }
 0x263   :  { %1562 = vmatprep.subr.bf16.mxu1 %v1877_v25 }
 0x266   :  { %1563 = vmatpush3.bf16.msra.mxu1 %v1745_v56 }
 0x269   :  { %1565 = vmatmul.mubr.bf16.vlgmr.msra.gmra.mrb[16].mxu1 %v1047_v60 }
 0x31c   :  { %v1533_v62 = vpop.f32.mrb[12].mxu1 }
 0x31d   :  { %v1534_v63 = vpop.f32.mrb[13].mxu1 }
 0x31e   :  { %v1535_v0 = vadd.f32 %v1534_v63, %v1533_v62  ;;  %v1536_v1 = vpop.f32.mrb[14].mxu1 }
 0x31f   :  { %v1537_v2 = vpop.f32.mrb[15].mxu1 }
 0x320   :  { %v1282_v4 = vadd.f32 %v1535_v0, %v1448_v3 }
 0x33c   :  { %v1321_v5 = vpop.f32.mrb[16].mxu1 }
 0x33d   :  { %v1322_v6 = vadd.f32 %v1321_v5, %v1282_v4  ;;  %v1566_v7 = vpop.f32.mrb[17].mxu1 }
 0x33e   :  { %v1324_v8 = vpop.f32.mrb[18].mxu1 }
 0x33f   :  { %1746 = vtanh.f32 %v1322_v6  ;;  %v1567_v9 = vpop.f32.mrb[19].mxu1 }
 0x349   :  { %v1747_v10 = vpop.eup %1746 }
 0x34a   :  { %1328 = vst [vmem:[#allocation10] sm:$0xff] %v1747_v10 }
 0x34b   :  { %1847 = shalt.err (!%p1844_p8)
}
 0x34c   :  { %s1848_s12 = scalar_lea.hbm %s2023_s7, 128 }
 0x34d   :  { %p1849_p9 = scmp.ne.s32.totalorder %s2023_s7, %s1848_s12  ;;  %p1852_p10 = scmp.lt.u32.totalorder %s1848_s12, %s2023_s7 }
 0x34f   :  { %p1854_p11 = pnand %p1852_p10, %p1849_p9 }
 0x351   :  { %1857 = shalt.err (!%p1854_p11)
}
 0x352   :  { %1338 = dma.vmem_to_hbm [thread:$0]  %s1336_s9, 128, %s2023_s7, [#allocation4]  }
 0x353   :  { %1864 = dma.done.wait [#allocation4], 128  }
 0x354   :  { %1865 = vsyncadd [#allocation4], 4294967168 }
 0x355   :  { %1342 = vsyncpa [#allocation3], 1 }
 0x356   :  { %1343 = vsyncpa [#allocation6], 1 }
 0x357   :  { %1344 = vsyncpa [#allocation9], 1 }
 0x358   :  { %1345 = vsyncpa [#allocation4], 1 }

</bundles_post_ra>
